<compile_context>
chip_gen: v6e
topology: v6e:2x2x1
jax: 0.10.0
libtpu: 0.0.40
codegen_flags: <defaults>
</compile_context>

<pallas_src>
import functools

import numpy as np
import jax
import jax.numpy as jnp
from jax import lax
from jax.experimental import pallas as pl
from jax.experimental.pallas import tpu as pltpu


_LANE = 128
_NEG_HUGE = -1e30                    # finite "-inf": exp(x - m) underflows to 0
_DEFAULT_BLOCK_ELEMS = 512 * 1024    # ~2 MiB f32 per input block


def _sum_kernel(x_ref, o_ref, acc_ref, *, inv_norm, n_total, tile_n, mask_tail):
    """Row-wise streaming sum over the flattened feature axis."""
    k = pl.program_id(1)

    @pl.when(k == 0)
    def _init():
        acc_ref[...] = jnp.zeros_like(acc_ref)

    x = x_ref[...].astype(jnp.float32)                       # (TB, TILE_N)
    if mask_tail:
        col = k * tile_n + lax.broadcasted_iota(jnp.int32, x.shape, 1)
        x = jnp.where(col < n_total, x, 0.0)
    acc_ref[...] += jnp.sum(x, axis=1, keepdims=True)        # lane reduce (XLU)

    @pl.when(k == pl.num_programs(1) - 1)
    def _finalize():
        o_ref[...] = (acc_ref[...] * inv_norm).astype(o_ref.dtype)


def _lse_kernel(x_ref, o_ref, m_ref, s_ref, *, inv_norm, n_total, tile_n, mask_tail):
    """Row-wise streaming (online) logsumexp over the flattened feature axis."""
    k = pl.program_id(1)

    @pl.when(k == 0)
    def _init():
        m_ref[...] = jnp.full_like(m_ref, _NEG_HUGE)
        s_ref[...] = jnp.zeros_like(s_ref)

    x = x_ref[...].astype(jnp.float32)                       # (TB, TILE_N)
    if mask_tail:
        col = k * tile_n + lax.broadcasted_iota(jnp.int32, x.shape, 1)
        x = jnp.where(col < n_total, x, _NEG_HUGE)

    tile_max = jnp.max(x, axis=1, keepdims=True)             # (TB, 1)
    m_new = jnp.maximum(m_ref[...], tile_max)
    alpha = jnp.exp(m_ref[...] - m_new)                      # rescale old partial sum
    s_ref[...] = s_ref[...] * alpha + jnp.sum(jnp.exp(x - m_new), axis=1, keepdims=True)
    m_ref[...] = m_new

    @pl.when(k == pl.num_programs(1) - 1)
    def _finalize():
        o_ref[...] = ((jnp.log(s_ref[...]) + m_ref[...]) * inv_norm).astype(o_ref.dtype)


def _streaming_reduce(x2d, *, mode, inv_norm, block_elems=_DEFAULT_BLOCK_ELEMS):
    """Reduce a (B, N) array along axis 1 with a tiled Pallas pipeline.

    mode: 'sum' -> sum(x)/norm ; 'lse' -> logsumexp(x)/norm.  Returns (B,).
    """
    B, N = x2d.shape

    # Batch-row block: full B when small, else 8-row (sublane quantum) blocks.
    tb = B if B <= 8 else 8
    # Feature tile: multiple of 128 lanes (or full N), capped so one block is
    # ~block_elems elements -> small, generation-independent VMEM footprint.
    tile_cap = max(_LANE, ((block_elems // tb) // _LANE) * _LANE)
    tile_n = N if N <= tile_cap else tile_cap

    b_blocks = pl.cdiv(B, tb)
    n_blocks = pl.cdiv(N, tile_n)
    mask_tail = (N % tile_n) != 0       # last feature tile overruns N -> mask it

    if mode == 'sum':
        kernel = functools.partial(_sum_kernel, inv_norm=inv_norm,
                                   n_total=N, tile_n=tile_n, mask_tail=mask_tail)
        scratch = [pltpu.VMEM((tb, 1), jnp.float32)]
    elif mode == 'lse':
        kernel = functools.partial(_lse_kernel, inv_norm=inv_norm,
                                   n_total=N, tile_n=tile_n, mask_tail=mask_tail)
        scratch = [pltpu.VMEM((tb, 1), jnp.float32),
                   pltpu.VMEM((tb, 1), jnp.float32)]
    else:
        raise ValueError(mode)

    out = pl.pallas_call(
        kernel,
        out_shape=jax.ShapeDtypeStruct((B, 1), x2d.dtype),
        grid_spec=pltpu.PrefetchScalarGridSpec(
            num_scalar_prefetch=0,
            grid=(b_blocks, n_blocks),
            in_specs=[pl.BlockSpec((tb, tile_n), lambda i, k: (i, k))],
            out_specs=pl.BlockSpec((tb, 1), lambda i, k: (i, 0)),
            scratch_shapes=scratch),
        compiler_params=pltpu.CompilerParams(
            # batch-row axis parallel (megacore on v7x), reduction axis last.
            dimension_semantics=("parallel", "arbitrary")),
    )(x2d)
    return out[:, 0]


class OutPutRealLayer:
    """JAX/Pallas port of OutPut_real_layer (no parameters)."""

    def __init__(self, F, dimensions='1d', output_mode='phi',
                 inverse_symmetry=False, Dp=2, block_elems=_DEFAULT_BLOCK_ELEMS):
        self.F = F                      # kept for API parity, unused in forward
        self.dimensions = dimensions
        self.output_mode = output_mode
        self._inverse_symmetry = inverse_symmetry
        self.Dp = Dp
        self._block_elems = block_elems

    def __call__(self, x, *args):
        if self._inverse_symmetry:
            x = x.reshape(-1, self.Dp * x.shape[1],
                          x.shape[-3], x.shape[-2], x.shape[-1])

        inv_norm = 1.0 / float(np.sqrt(np.prod(x.shape[1:])))
        B = x.shape[0]
        x2d = x.reshape(B, -1)          # free on contiguous data: lane-dense layout

        if self.dimensions == '1d':
            assert x.ndim == 3, "1d path expects (B, C, L)"
            return _streaming_reduce(x2d, mode='sum', inv_norm=inv_norm,
                                     block_elems=self._block_elems)
        elif self.output_mode == 'phi':
            assert x.ndim == 5, "2d 'phi' path expects (B, C, D, H, W)"
            return _streaming_reduce(x2d, mode='lse', inv_norm=inv_norm,
                                     block_elems=self._block_elems)
        else:
            # angle(sum(exp(1j*x)/norm)) == atan2(sum(sin x), sum(cos x));
            # the positive 1/norm scale does not change the angle.
            # TODO(synk): sin/cos/atan2 stay in plain XLA; only the two
            # streaming sum reductions run in Pallas.
            assert x.ndim == 5, "complex 'theta' path expects (B, C, D, H, W)"
            xf = x2d.astype(jnp.float32)
            s = _streaming_reduce(jnp.sin(xf), mode='sum', inv_norm=inv_norm,
                                  block_elems=self._block_elems)
            c = _streaming_reduce(jnp.cos(xf), mode='sum', inv_norm=inv_norm,
                                  block_elems=self._block_elems)
            return jnp.arctan2(s, c).astype(x.dtype)


if __name__ == "__main__":
    key = jax.random.PRNGKey(0)
    k1, k2, k3, k4 = jax.random.split(key, 4)

    # --- default config: dimensions='1d' -> sum over dims [1,2] / sqrt(C*L)
    x1 = jax.random.normal(k1, (2, 4, 16), dtype=jnp.float32)
    y1 = jax.block_until_ready(OutPutRealLayer(F=4, dimensions='1d')(x1))
    ref1 = jnp.sum(x1, axis=(1, 2)) / np.sqrt(np.prod(x1.shape[1:]))
    assert y1.shape == (2,)
    assert jnp.allclose(y1, ref1, atol=1e-5, rtol=1e-5), (y1, ref1)

    # --- 2d 'phi' config: logsumexp over dims [1..4] / sqrt(prod(shape[1:]))
    x2 = jax.random.normal(k2, (2, 4, 2, 8, 8), dtype=jnp.float32)
    y2 = jax.block_until_ready(
        OutPutRealLayer(F=4, dimensions='2d', output_mode='phi')(x2))
    ref2 = jax.scipy.special.logsumexp(
        x2.reshape(2, -1), axis=1) / np.sqrt(np.prod(x2.shape[1:]))
    assert y2.shape == (2,)
    assert jnp.allclose(y2, ref2, atol=1e-5, rtol=1e-5), (y2, ref2)

    # --- tiled multi-block path (small block_elems forces a reduction grid
    #     axis with a masked ragged tail: N=2880, tile=256 -> 12 blocks)
    x3 = jax.random.normal(k3, (3, 2, 5, 8, 36), dtype=jnp.float32)
    y3 = jax.block_until_ready(
        OutPutRealLayer(F=4, dimensions='2d', output_mode='phi',
                        block_elems=1024)(x3))
    ref3 = jax.scipy.special.logsumexp(
        x3.reshape(3, -1), axis=1) / np.sqrt(np.prod(x3.shape[1:]))
    assert y3.shape == (3,)
    assert jnp.allclose(y3, ref3, atol=1e-5, rtol=1e-5), (y3, ref3)

    # --- complex 'theta' branch: angle of sum(exp(1j*x))/norm
    x4 = jax.random.normal(k4, (2, 3, 2, 6, 6), dtype=jnp.float32)
    y4 = jax.block_until_ready(
        OutPutRealLayer(F=4, dimensions='2d', output_mode='theta')(x4))
    ref4 = jnp.arctan2(jnp.sum(jnp.sin(x4), axis=(1, 2, 3, 4)),
                       jnp.sum(jnp.cos(x4), axis=(1, 2, 3, 4)))
    assert y4.shape == (2,)
    assert jnp.allclose(y4, ref4, atol=1e-5, rtol=1e-5), (y4, ref4)

    print("KERNEL_OK")
</pallas_src>

<mosaic_0001>
module attributes {stable_mosaic.version = 11 : i64} {
  func.func @_sum_kernel(%arg0: i32, %arg1: i32, %arg2: memref<2x64xf32, #tpu.memory_space<vmem>>, %arg3: memref<2x1xf32, #tpu.memory_space<vmem>>, %arg4: memref<2x1xf32, #tpu.memory_space<vmem>>) attributes {dimension_semantics = [#tpu.dimension_semantics<parallel>, #tpu.dimension_semantics<arbitrary>], iteration_bounds = array<i64: 1, 1>, scalar_prefetch = 0 : i64, scratch_operands = 1 : i64, tpu.core_type = #tpu.core_type<tc>, window_params = [{transform_indices = @transform_0, window_bounds = array<i64: 2, 64>}, {transform_indices = @transform_1, window_bounds = array<i64: 2, 1>}]} {
    %c0_i32 = arith.constant 0 : i32
    %0 = arith.cmpi eq, %arg1, %c0_i32 : i32
    %1 = arith.extui %0 : i1 to i32
    %c0_i32_0 = arith.constant 0 : i32
    %2 = arith.cmpi ne, %1, %c0_i32_0 : i32
    scf.if %2 {
      %cst_8 = arith.constant 0.000000e+00 : f32
      %12 = vector.broadcast %cst_8 : f32 to vector<2x1xf32>
      %c0_9 = arith.constant 0 : index
      %c0_10 = arith.constant 0 : index
      %13 = vector.load %arg4[%c0_9, %c0_10] : memref<2x1xf32, #tpu.memory_space<vmem>>, vector<2x1xf32>
      tpu.vector_store %arg4[%c0_9, %c0_10], %12 {strides = array<i32>} : memref<2x1xf32, #tpu.memory_space<vmem>>, vector<2x1xf32>,
    } else {
    }
    %c0 = arith.constant 0 : index
    %c0_1 = arith.constant 0 : index
    %3 = vector.load %arg2[%c0, %c0_1] : memref<2x64xf32, #tpu.memory_space<vmem>>, vector<2x64xf32>
    %c0_2 = arith.constant 0 : index
    %c0_3 = arith.constant 0 : index
    %4 = vector.load %arg4[%c0_2, %c0_3] : memref<2x1xf32, #tpu.memory_space<vmem>>, vector<2x1xf32>
    %cst = arith.constant dense<0.000000e+00> : vector<2xf32>
    %5 = vector.multi_reduction <add>, %3, %cst [1] : vector<2x64xf32> to vector<2xf32>
    %6 = vector.shape_cast %5 : vector<2xf32> to vector<2x1xf32>
    %7 = arith.addf %4, %6 : vector<2x1xf32>
    %c0_4 = arith.constant 0 : index
    %c0_5 = arith.constant 0 : index
    %8 = vector.load %arg4[%c0_4, %c0_5] : memref<2x1xf32, #tpu.memory_space<vmem>>, vector<2x1xf32>
    tpu.vector_store %arg4[%c0_4, %c0_5], %7 {strides = array<i32>} : memref<2x1xf32, #tpu.memory_space<vmem>>, vector<2x1xf32>,
    %c0_i32_6 = arith.constant 0 : i32
    %9 = arith.cmpi eq, %arg1, %c0_i32_6 : i32
    %10 = arith.extui %9 : i1 to i32
    %c0_i32_7 = arith.constant 0 : i32
    %11 = arith.cmpi ne, %10, %c0_i32_7 : i32
    scf.if %11 {
      %c0_8 = arith.constant 0 : index
      %c0_9 = arith.constant 0 : index
      %12 = vector.load %arg4[%c0_8, %c0_9] : memref<2x1xf32, #tpu.memory_space<vmem>>, vector<2x1xf32>
      %cst_10 = arith.constant 1.250000e-01 : f32
      %13 = vector.broadcast %cst_10 : f32 to vector<2x1xf32>
      %14 = arith.mulf %12, %13 : vector<2x1xf32>
      %c0_11 = arith.constant 0 : index
      %c0_12 = arith.constant 0 : index
      %15 = vector.load %arg3[%c0_11, %c0_12] : memref<2x1xf32, #tpu.memory_space<vmem>>, vector<2x1xf32>
      tpu.vector_store %arg3[%c0_11, %c0_12], %14 {strides = array<i32>} : memref<2x1xf32, #tpu.memory_space<vmem>>, vector<2x1xf32>,
    } else {
    }
    return
  }
  func.func @transform_0(%arg0: i32, %arg1: i32) -> (i32, i32) {
    %c0_i32 = arith.constant 0 : i32
    return %arg0, %arg1 : i32, i32
  }
  func.func @transform_1(%arg0: i32, %arg1: i32) -> (i32, i32) {
    %c0_i32 = arith.constant 0 : i32
    %c0_i32_0 = arith.constant 0 : i32
    return %arg0, %c0_i32 : i32, i32
  }
}

</mosaic_0001>

<bundles_post_ra>
// kernel: tpu_custom_call.1
= control target key start
LH: loop header
LB: loop body
LE: loop exit
PB: predicated region body
PF: predicated region fallthrough
CT: control target
= control target key end

     0   :  { %6 = vsyncpa [#allocation4], 0  ;;  %s70_s6 = smov [#allocation3]   ;;  %s88_s0 = inlined_call_operand.hbm [shape: f32[2,64], index: 0, kind: input, shape index: {}]   ;;  %s89_s1 = inlined_call_operand.vmem [shape: f32[2,1], index: 1, kind: output, shape index: {}]  }
   0x1   :  { %s13_s7 = sshll.u32 %s70_s6, 4  ;;  %s14_s7 = int_to_ptr.vmem [resolvable:$true] %s13_s7 }
   0x2   :  { %s56_s8 = scalar_lea.vmem %s14_s7, 32  ;;  %p61_p1 = scmp.lt.s32.totalorder %s14_s7, %s14_s7 }
   0x3   :  { %p57_p0 = scmp.ne.s32.totalorder %s14_s7, %s56_s8  ;;  %p62_p2 = scmp.lt.s32.totalorder %s56_s8, %s56_s8 }
   0x5   :  { %p63_p3 = por %p62_p2, %p61_p1 }
   0x7   :  { %p64_p4 = pnand %p63_p3, %p57_p0 }
   0x9   :  { %67 = shalt.err (!%p64_p4)
}
   0xa   :  { %16 = dma.hbm_to_vmem [thread:$0]  %s88_s0, 32, %s14_s7, [#allocation4]  }
   0xb   :  { %68 = dma.done.wait [#allocation4], 32  }
   0xc   :  { %69 = vsyncadd [#allocation4], 4294967264  ;;  %vm24_vm0 = vcmask 1024   ;;  %v71_v0 = vmov 0.0   ;;  %vm28_vm1 = vcmask 517120  }
   0xd   :  { %25 = vst.msk [vmem:[#allocation2] sm:$0x3] %vm24_vm0, %v71_v0  ;;  %v26_v1 = vld [vmem:[#allocation3] sm:$0x3] }
   0xe   :  { %v29_v2 = vsel %vm28_vm1, %v26_v1, 0.0 }
   0xf   :  { %30 = vadd.xlane.f32.xlu0 %v29_v2 }
  0x14   :  { %v27_v3 = vld [vmem:[#allocation2] sm:$0x3] }
  0x98   :  { %v31_v4 = vpop.xlane.xlu0 %30 }
  0x99   :  { %v32_v5 = vadd.f32 %v31_v4, %v27_v3 }
  0x9b   :  { %34 = vst.msk [vmem:[#allocation2] sm:$0x3] %vm24_vm0, %v32_v5 }
  0xa2   :  { %v38_v6 = vld [vmem:[#allocation2] sm:$0x3] }
  0xa3   :  { %v39_v7 = vmul.f32 0.125, %v38_v6 }
  0xa5   :  { %40 = vst.msk [vmem:[%s89_s1] sm:$0x3] %vm24_vm0, %v39_v7 }
  0xa6   :  { %45 = vsyncpa [#allocation4], 1 }

</bundles_post_ra>
